<compile_context>
chip_gen: v7x
topology: tpu7x:2x2x1
jax: 0.10.0
libtpu: 0.0.40
codegen_flags: <defaults>
</compile_context>

<pallas_src>
import jax
import jax.numpy as jnp
from jax.experimental import pallas as pl
from jax.experimental.pallas import tpu as pltpu

ROW = 16  # batch granularity: bf16 packs 2 rows/sublane -> keep tiles 16-row aligned


def net1_kernel(x_ref, w0_ref, b0_ref, w1_ref, b1_ref, w2_ref, b2_ref,
                wpx_ref, wph_ref, bp_ref, out_ref):
    cdt = w0_ref.dtype
    x = x_ref[...]                                                    # (TB, F)

    h = jnp.dot(x, w0_ref[...], preferred_element_type=jnp.float32) + b0_ref[...]
    h = jnp.maximum(h, 0.0)
    h = jnp.dot(h.astype(cdt), w1_ref[...],
                preferred_element_type=jnp.float32) + b1_ref[...]
    h = jnp.maximum(h, 0.0)
    h = jnp.dot(h.astype(cdt), w2_ref[...],
                preferred_element_type=jnp.float32) + b2_ref[...]
    h = jnp.maximum(h, 0.0)

    # predict(concat([x, h])) == x @ Wp[:F] + h @ Wp[F:]  (no concat/relayout).
    out = (jnp.dot(x, wpx_ref[...], preferred_element_type=jnp.float32)
           + jnp.dot(h.astype(cdt), wph_ref[...],
                     preferred_element_type=jnp.float32)
           + bp_ref[...])
    out_ref[...] = out.astype(out_ref.dtype)                          # (TB, n_output)


def init_params(key, n_feature, n_hidden, n_hidden1, n_hidden2, n_output):
    """torch.nn.Linear-style init (U(-1/sqrt(in), 1/sqrt(in))), weights stored
    pre-transposed as [in, out] so the kernel computes x @ W + b."""
    def linear(k, fan_in, fan_out):
        kw, kb = jax.random.split(k)
        bound = 1.0 / (fan_in ** 0.5)
        w = jax.random.uniform(kw, (fan_in, fan_out), jnp.float32, -bound, bound)
        b = jax.random.uniform(kb, (1, fan_out), jnp.float32, -bound, bound)
        return w, b

    k0, k1, k2, kp = jax.random.split(key, 4)
    w0, b0 = linear(k0, n_feature, n_hidden)
    w1, b1 = linear(k1, n_hidden, n_hidden1)
    w2, b2 = linear(k2, n_hidden1, n_hidden2)
    wp, bp = linear(kp, n_feature + n_hidden2, n_output)
    return (w0, b0, w1, b1, w2, b2, wp, bp)


def prepare_params(params, compute_dtype=jnp.float32):
    """One-time preprocessing (do NOT call per forward): cast matmul operands to
    the chosen compute dtype, keep biases f32, split Wp into its x / h halves."""
    (w0, b0, w1, b1, w2, b2, wp, bp) = params
    n_feature = w0.shape[0]
    cdt = compute_dtype
    return (w0.astype(cdt), b0.astype(jnp.float32),
            w1.astype(cdt), b1.astype(jnp.float32),
            w2.astype(cdt), b2.astype(jnp.float32),
            wp[:n_feature].astype(cdt), wp[n_feature:].astype(cdt),
            bp.astype(jnp.float32))


def net1_dense(x, prep):
    """Fused pure-XLA path (small-batch fast path and numerical reference)."""
    (w0, b0, w1, b1, w2, b2, wpx, wph, bp) = prep
    cdt = w0.dtype
    xc = x.astype(cdt)
    h = jax.nn.relu(jnp.dot(xc, w0, preferred_element_type=jnp.float32) + b0)
    h = jax.nn.relu(jnp.dot(h.astype(cdt), w1, preferred_element_type=jnp.float32) + b1)
    h = jax.nn.relu(jnp.dot(h.astype(cdt), w2, preferred_element_type=jnp.float32) + b2)
    return (jnp.dot(xc, wpx, preferred_element_type=jnp.float32)
            + jnp.dot(h.astype(cdt), wph, preferred_element_type=jnp.float32) + bp)


def net1_forward(x, prep, *, tile_b=4096, min_pallas_batch=2048,
                 force_pallas=False):
    """x: (B, n_feature) f32. prep: output of prepare_params."""
    (w0, b0, w1, b1, w2, b2, wpx, wph, bp) = prep
    B, n_feature = x.shape
    n_output = bp.shape[-1]
    cdt = w0.dtype

    # Small-batch fast path: a 1-step Pallas grid is pure overhead there.
    if (not force_pallas) and B < min_pallas_batch:
        return net1_dense(x, prep)

    x_c = x.astype(cdt)

    # Batch tiling: 16-row granularity, big tiles to amortize ~0.35 us/step,
    # but keep >= 2 grid steps when possible so v7x's two TCs both run.
    B_r = ((B + ROW - 1) // ROW) * ROW
    tb = max(ROW, (min(tile_b, B_r) // ROW) * ROW)
    if B_r >= 2 * ROW and B_r // tb < 2:
        tb = max(ROW, ((B_r // 2) // ROW) * ROW)

    B_pad = ((B + tb - 1) // tb) * tb
    if B_pad != B:
        x_c = jnp.zeros((B_pad, n_feature), cdt).at[:B].set(x_c)

    # Constant index_map => weights/biases stay resident in VMEM (no re-DMA).
    full = lambda a: pl.BlockSpec(a.shape, lambda i: (0,) * a.ndim)

    out = pl.pallas_call(
        net1_kernel,
        out_shape=jax.ShapeDtypeStruct((B_pad, n_output), jnp.float32),
        grid_spec=pltpu.PrefetchScalarGridSpec(
            num_scalar_prefetch=0,
            grid=(B_pad // tb,),
            in_specs=[
                pl.BlockSpec((tb, n_feature), lambda i: (i, 0)),   # x tile
                full(w0), full(b0),
                full(w1), full(b1),
                full(w2), full(b2),
                full(wpx), full(wph), full(bp),
            ],
            # Block last dim == full array dim (n_output): byte-minimal store.
            out_specs=pl.BlockSpec((tb, n_output), lambda i: (i, 0)),
        ),
        compiler_params=pltpu.CompilerParams(
            dimension_semantics=("parallel",),
            vmem_limit_bytes=32 * 1024 * 1024),
    )(x_c, w0, b0, w1, b1, w2, b2, wpx, wph, bp)

    return out[:B]


if __name__ == "__main__":
    n_feature, n_hidden, n_hidden1, n_hidden2, n_output = 16, 32, 32, 16, 8

    key = jax.random.PRNGKey(0)
    kx1, kx2, kp = jax.random.split(key, 3)
    params = init_params(kp, n_feature, n_hidden, n_hidden1, n_hidden2, n_output)

    # --- f32-operand path (PyTorch parity), small batch, single grid step ---
    prep32 = prepare_params(params, jnp.float32)
    x_small = jax.random.normal(kx1, (16, n_feature), jnp.float32)
    out32 = jax.block_until_ready(net1_forward(x_small, prep32, force_pallas=True))
    ref32 = net1_dense(x_small, prep32)
    assert out32.shape == (16, n_output)
    assert jnp.allclose(out32, ref32, atol=1e-4, rtol=1e-4), \
        f"f32 path max abs err {float(jnp.max(jnp.abs(out32 - ref32)))}"

    # --- bf16-operand path, ragged batch -> padded multi-step grid ---------
    prep16 = prepare_params(params, jnp.bfloat16)
    x_rag = jax.random.normal(kx2, (100, n_feature), jnp.float32)
    out16 = jax.block_until_ready(net1_forward(x_rag, prep16, force_pallas=True))
    ref16 = net1_dense(x_rag, prep16)
    assert out16.shape == (100, n_output)
    assert jnp.allclose(out16, ref16, atol=2e-2, rtol=2e-2), \
        f"bf16 path max abs err {float(jnp.max(jnp.abs(out16 - ref16)))}"

    # --- small-batch fast path (no Pallas) sanity check ---------------------
    out_fast = jax.block_until_ready(net1_forward(x_small, prep32))
    assert jnp.allclose(out_fast, ref32, atol=1e-5, rtol=1e-5)

    print("KERNEL_OK")
</pallas_src>

<mosaic_0001>
module attributes {stable_mosaic.version = 11 : i64} {
  func.func @net1_kernel(%arg0: i32, %arg1: memref<16x16xf32, #tpu.memory_space<vmem>>, %arg2: memref<16x32xf32, #tpu.memory_space<vmem>>, %arg3: memref<1x32xf32, #tpu.memory_space<vmem>>, %arg4: memref<32x32xf32, #tpu.memory_space<vmem>>, %arg5: memref<1x32xf32, #tpu.memory_space<vmem>>, %arg6: memref<32x16xf32, #tpu.memory_space<vmem>>, %arg7: memref<1x16xf32, #tpu.memory_space<vmem>>, %arg8: memref<16x8xf32, #tpu.memory_space<vmem>>, %arg9: memref<16x8xf32, #tpu.memory_space<vmem>>, %arg10: memref<1x8xf32, #tpu.memory_space<vmem>>, %arg11: memref<16x8xf32, #tpu.memory_space<vmem>>) attributes {dimension_semantics = [#tpu.dimension_semantics<parallel>], iteration_bounds = array<i64: 1>, scalar_prefetch = 0 : i64, scratch_operands = 0 : i64, tpu.core_type = #tpu.core_type<tc>, window_params = [{transform_indices = @transform_0, window_bounds = array<i64: 16, 16>}, {pipeline_mode = #tpu.pipeline_mode<synchronous>, transform_indices = @transform_1, window_bounds = array<i64: 16, 32>}, {pipeline_mode = #tpu.pipeline_mode<synchronous>, transform_indices = @transform_2, window_bounds = array<i64: 1, 32>}, {pipeline_mode = #tpu.pipeline_mode<synchronous>, transform_indices = @transform_3, window_bounds = array<i64: 32, 32>}, {pipeline_mode = #tpu.pipeline_mode<synchronous>, transform_indices = @transform_4, window_bounds = array<i64: 1, 32>}, {pipeline_mode = #tpu.pipeline_mode<synchronous>, transform_indices = @transform_5, window_bounds = array<i64: 32, 16>}, {pipeline_mode = #tpu.pipeline_mode<synchronous>, transform_indices = @transform_6, window_bounds = array<i64: 1, 16>}, {pipeline_mode = #tpu.pipeline_mode<synchronous>, transform_indices = @transform_7, window_bounds = array<i64: 16, 8>}, {pipeline_mode = #tpu.pipeline_mode<synchronous>, transform_indices = @transform_8, window_bounds = array<i64: 16, 8>}, {pipeline_mode = #tpu.pipeline_mode<synchronous>, transform_indices = @transform_9, window_bounds = array<i64: 1, 8>}, {transform_indices = @transform_10, window_bounds = array<i64: 16, 8>}]} {
    %c0 = arith.constant 0 : index
    %c0_0 = arith.constant 0 : index
    %0 = vector.load %arg1[%c0, %c0_0] : memref<16x16xf32, #tpu.memory_space<vmem>>, vector<16x16xf32>
    %c0_1 = arith.constant 0 : index
    %c0_2 = arith.constant 0 : index
    %1 = vector.load %arg2[%c0_1, %c0_2] : memref<16x32xf32, #tpu.memory_space<vmem>>, vector<16x32xf32>
    %cst = arith.constant dense<0.000000e+00> : vector<16x32xf32>
    %2 = tpu.matmul %0, %1, %cst {dimension_numbers = #tpu.dot_dimension_numbers<[1], [0], [0], [1], [0, 0, 1, 1], [], []>} : vector<16x16xf32>, vector<16x32xf32>, vector<16x32xf32> -> vector<16x32xf32>
    %c0_3 = arith.constant 0 : index
    %c0_4 = arith.constant 0 : index
    %3 = vector.load %arg3[%c0_3, %c0_4] : memref<1x32xf32, #tpu.memory_space<vmem>>, vector<1x32xf32>
    %4 = vector.broadcast %3 : vector<1x32xf32> to vector<16x32xf32>
    %5 = arith.addf %2, %4 : vector<16x32xf32>
    %cst_5 = arith.constant 0.000000e+00 : f32
    %6 = vector.broadcast %cst_5 : f32 to vector<16x32xf32>
    %7 = arith.maximumf %5, %6 : vector<16x32xf32>
    %c0_6 = arith.constant 0 : index
    %c0_7 = arith.constant 0 : index
    %8 = vector.load %arg4[%c0_6, %c0_7] : memref<32x32xf32, #tpu.memory_space<vmem>>, vector<32x32xf32>
    %cst_8 = arith.constant dense<0.000000e+00> : vector<16x32xf32>
    %9 = tpu.matmul %7, %8, %cst_8 {dimension_numbers = #tpu.dot_dimension_numbers<[1], [0], [0], [1], [0, 0, 1, 1], [], []>} : vector<16x32xf32>, vector<32x32xf32>, vector<16x32xf32> -> vector<16x32xf32>
    %c0_9 = arith.constant 0 : index
    %c0_10 = arith.constant 0 : index
    %10 = vector.load %arg5[%c0_9, %c0_10] : memref<1x32xf32, #tpu.memory_space<vmem>>, vector<1x32xf32>
    %11 = vector.broadcast %10 : vector<1x32xf32> to vector<16x32xf32>
    %12 = arith.addf %9, %11 : vector<16x32xf32>
    %cst_11 = arith.constant 0.000000e+00 : f32
    %13 = vector.broadcast %cst_11 : f32 to vector<16x32xf32>
    %14 = arith.maximumf %12, %13 : vector<16x32xf32>
    %c0_12 = arith.constant 0 : index
    %c0_13 = arith.constant 0 : index
    %15 = vector.load %arg6[%c0_12, %c0_13] : memref<32x16xf32, #tpu.memory_space<vmem>>, vector<32x16xf32>
    %cst_14 = arith.constant dense<0.000000e+00> : vector<16x16xf32>
    %16 = tpu.matmul %14, %15, %cst_14 {dimension_numbers = #tpu.dot_dimension_numbers<[1], [0], [0], [1], [0, 0, 1, 1], [], []>} : vector<16x32xf32>, vector<32x16xf32>, vector<16x16xf32> -> vector<16x16xf32>
    %c0_15 = arith.constant 0 : index
    %c0_16 = arith.constant 0 : index
    %17 = vector.load %arg7[%c0_15, %c0_16] : memref<1x16xf32, #tpu.memory_space<vmem>>, vector<1x16xf32>
    %18 = vector.broadcast %17 : vector<1x16xf32> to vector<16x16xf32>
    %19 = arith.addf %16, %18 : vector<16x16xf32>
    %cst_17 = arith.constant 0.000000e+00 : f32
    %20 = vector.broadcast %cst_17 : f32 to vector<16x16xf32>
    %21 = arith.maximumf %19, %20 : vector<16x16xf32>
    %c0_18 = arith.constant 0 : index
    %c0_19 = arith.constant 0 : index
    %22 = vector.load %arg8[%c0_18, %c0_19] : memref<16x8xf32, #tpu.memory_space<vmem>>, vector<16x8xf32>
    %cst_20 = arith.constant dense<0.000000e+00> : vector<16x8xf32>
    %23 = tpu.matmul %0, %22, %cst_20 {dimension_numbers = #tpu.dot_dimension_numbers<[1], [0], [0], [1], [0, 0, 1, 1], [], []>} : vector<16x16xf32>, vector<16x8xf32>, vector<16x8xf32> -> vector<16x8xf32>
    %c0_21 = arith.constant 0 : index
    %c0_22 = arith.constant 0 : index
    %24 = vector.load %arg9[%c0_21, %c0_22] : memref<16x8xf32, #tpu.memory_space<vmem>>, vector<16x8xf32>
    %cst_23 = arith.constant dense<0.000000e+00> : vector<16x8xf32>
    %25 = tpu.matmul %21, %24, %cst_23 {dimension_numbers = #tpu.dot_dimension_numbers<[1], [0], [0], [1], [0, 0, 1, 1], [], []>} : vector<16x16xf32>, vector<16x8xf32>, vector<16x8xf32> -> vector<16x8xf32>
    %26 = arith.addf %23, %25 : vector<16x8xf32>
    %c0_24 = arith.constant 0 : index
    %c0_25 = arith.constant 0 : index
    %27 = vector.load %arg10[%c0_24, %c0_25] : memref<1x8xf32, #tpu.memory_space<vmem>>, vector<1x8xf32>
    %28 = vector.broadcast %27 : vector<1x8xf32> to vector<16x8xf32>
    %29 = arith.addf %26, %28 : vector<16x8xf32>
    %c0_26 = arith.constant 0 : index
    %c0_27 = arith.constant 0 : index
    %30 = vector.load %arg11[%c0_26, %c0_27] : memref<16x8xf32, #tpu.memory_space<vmem>>, vector<16x8xf32>
    tpu.vector_store %arg11[%c0_26, %c0_27], %29 {strides = array<i32>} : memref<16x8xf32, #tpu.memory_space<vmem>>, vector<16x8xf32>,
    return
  }
  func.func @transform_0(%arg0: i32) -> (i32, i32) {
    %c0_i32 = arith.constant 0 : i32
    %c0_i32_0 = arith.constant 0 : i32
    return %arg0, %c0_i32 : i32, i32
  }
  func.func @transform_1(%arg0: i32) -> (i32, i32) {
    %c0_i32 = arith.constant 0 : i32
    %c0_i32_0 = arith.constant 0 : i32
    %c0_i32_1 = arith.constant 0 : i32
    return %c0_i32, %c0_i32_0 : i32, i32
  }
  func.func @transform_2(%arg0: i32) -> (i32, i32) {
    %c0_i32 = arith.constant 0 : i32
    %c0_i32_0 = arith.constant 0 : i32
    %c0_i32_1 = arith.constant 0 : i32
    return %c0_i32, %c0_i32_0 : i32, i32
  }
  func.func @transform_3(%arg0: i32) -> (i32, i32) {
    %c0_i32 = arith.constant 0 : i32
    %c0_i32_0 = arith.constant 0 : i32
    %c0_i32_1 = arith.constant 0 : i32
    return %c0_i32, %c0_i32_0 : i32, i32
  }
  func.func @transform_4(%arg0: i32) -> (i32, i32) {
    %c0_i32 = arith.constant 0 : i32
    %c0_i32_0 = arith.constant 0 : i32
    %c0_i32_1 = arith.constant 0 : i32
    return %c0_i32, %c0_i32_0 : i32, i32
  }
  func.func @transform_5(%arg0: i32) -> (i32, i32) {
    %c0_i32 = arith.constant 0 : i32
    %c0_i32_0 = arith.constant 0 : i32
    %c0_i32_1 = arith.constant 0 : i32
    return %c0_i32, %c0_i32_0 : i32, i32
  }
  func.func @transform_6(%arg0: i32) -> (i32, i32) {
    %c0_i32 = arith.constant 0 : i32
    %c0_i32_0 = arith.constant 0 : i32
    %c0_i32_1 = arith.constant 0 : i32
    return %c0_i32, %c0_i32_0 : i32, i32
  }
  func.func @transform_7(%arg0: i32) -> (i32, i32) {
    %c0_i32 = arith.constant 0 : i32
    %c0_i32_0 = arith.constant 0 : i32
    %c0_i32_1 = arith.constant 0 : i32
    return %c0_i32, %c0_i32_0 : i32, i32
  }
  func.func @transform_8(%arg0: i32) -> (i32, i32) {
    %c0_i32 = arith.constant 0 : i32
    %c0_i32_0 = arith.constant 0 : i32
    %c0_i32_1 = arith.constant 0 : i32
    return %c0_i32, %c0_i32_0 : i32, i32
  }
  func.func @transform_9(%arg0: i32) -> (i32, i32) {
    %c0_i32 = arith.constant 0 : i32
    %c0_i32_0 = arith.constant 0 : i32
    %c0_i32_1 = arith.constant 0 : i32
    return %c0_i32, %c0_i32_0 : i32, i32
  }
  func.func @transform_10(%arg0: i32) -> (i32, i32) {
    %c0_i32 = arith.constant 0 : i32
    %c0_i32_0 = arith.constant 0 : i32
    return %arg0, %c0_i32 : i32, i32
  }
}

</mosaic_0001>

<bundles_post_ra>
// kernel: tpu_custom_call.1
= control target key start
LH: loop header
LB: loop body
LE: loop exit
PB: predicated region body
PF: predicated region fallthrough
CT: control target
= control target key end

     0   :  { %vm46_vm0 = vcmask 130048   ;;  %vm141_vm1 = vcmask 261120   ;;  %vm488_vm2 = vcmask 64512   ;;  %s745_s1 = inlined_call_operand.vmem [shape: f32[16,32], index: 1, kind: input, shape index: {}]   ;;  %s746_s0 = inlined_call_operand.vmem [shape: f32[16,16], index: 0, kind: input, shape index: {}]   ;;  %s747_s3 = inlined_call_operand.vmem [shape: f32[32,32], index: 3, kind: input, shape index: {}]   ;;  %s748_s5 = inlined_call_operand.vmem [shape: f32[32,16], index: 5, kind: input, shape index: {}]   ;;  %s749_s2 = inlined_call_operand.vmem [shape: f32[1,32], index: 2, kind: input, shape index: {}]   ;;  %s750_s4 = inlined_call_operand.vmem [shape: f32[1,32], index: 4, kind: input, shape index: {}]   ;;  %s751_s8 = inlined_call_operand.vmem [shape: f32[16,8], index: 8, kind: input, shape index: {}]   ;;  %s752_s7 = inlined_call_operand.vmem [shape: f32[16,8], index: 7, kind: input, shape index: {}]   ;;  %s753_s6 = inlined_call_operand.vmem [shape: f32[1,16], index: 6, kind: input, shape index: {}]   ;;  %s754_s9 = inlined_call_operand.vmem [shape: f32[1,8], index: 9, kind: input, shape index: {}]   ;;  %s755_s10 = inlined_call_operand.vmem [shape: f32[16,8], index: 10, kind: output, shape index: {}]  }
   0x1   :  { %v37_v0 = vld [vmem:[%s745_s1] sm:$0xff]  ;;  %v38_v1 = vld [vmem:[%s745_s1 + $0x8] sm:$0xff]  ;;  %v132_v8 = vld [vmem:[%s747_s3 + $0x10] sm:$0xff] }
   0x2   :  { %v670_v2 = vld [vmem:[%s746_s0] sm:$0xff]  ;;  %v576_v3 = vpack.c.bf16 %v38_v1, %v37_v0  ;;  %v131_v5 = vld [vmem:[%s747_s3 + $0x8] sm:$0xff]  ;;  %v133_v9 = vld [vmem:[%s747_s3 + $0x18] sm:$0xff] }
   0x3   :  { %537 = vmatprep.mubr.msk.f32.mxu0 %vm46_vm0, %v670_v2  ;;  %v130_v4 = vld [vmem:[%s747_s3] sm:$0xff]  ;;  %v683_v7 = vld [vmem:[%s746_s0 + $0x8] sm:$0xff]  ;;  %v584_v10 = vpack.c.bf16 %v133_v9, %v132_v8  ;;  %v227_v21 = vld [vmem:[%s748_s5 + $0x10] sm:$0xff] }
   0x4   :  { %v580_v6 = vpack.c.bf16 %v131_v5, %v130_v4  ;;  %577 = vmatprep.subr.bf16.mxu0 %v576_v3  ;;  %v225_v11 = vld [vmem:[%s748_s5] sm:$0xff]  ;;  %v226_v12 = vld [vmem:[%s748_s5 + $0x8] sm:$0xff]  ;;  %v228_v22 = vld [vmem:[%s748_s5 + $0x18] sm:$0xff] }
   0x5   :  { %579 = vmatpush3.bf16.msra.mxu0 %v576_v3  ;;  %v588_v13 = vpack.c.bf16 %v226_v12, %v225_v11  ;;  %v495_v14 = vld [vmem:[%s749_s2] ss:$0 sm:$0xff]  ;;  %v592_v23 = vpack.c.bf16 %v228_v22, %v227_v21  ;;  %v322_v32 = vld [vmem:[%s751_s8 + $0x8] sm:$0xff] }
   0x6   :  { %581 = vmatprep.subr.bf16.mxu1 %v580_v6  ;;  %v498_v24 = vld [vmem:[%s750_s4] ss:$0 sm:$0xff]  ;;  %v320_v35 = vld [vmem:[%s752_s7 + $0x8] sm:$0xff] }
   0x7   :  { %583 = vmatpush3.bf16.msra.mxu1 %v580_v6  ;;  %589 = vmatprep.subr.bf16.mxu0 %v588_v13  ;;  %v321_v31 = vld [vmem:[%s751_s8] sm:$0xff] }
   0x8   :  { %538 = vmatmul.mubr.msk.f32.vlgmr.msra.gmra.mrb[0].mxu0 %vm46_vm0, %v683_v7  ;;  %585 = vmatprep.subr.bf16.mxu1 %v584_v10  ;;  %v596_v33 = vpack.c.bf16 %v322_v32, %v321_v31  ;;  %v319_v34 = vld [vmem:[%s752_s7] sm:$0xff] }
   0x9   :  { %591 = vmatpush3.bf16.msra.mxu0 %v588_v13  ;;  %v600_v36 = vpack.c.bf16 %v320_v35, %v319_v34  ;;  %v501_v37 = vld [vmem:[%s753_s6] ss:$0 sm:$0xff] }
   0xa   :  { %593 = vmatprep.subr.bf16.mxu0 %v592_v23  ;;  %v508_v44 = vld [vmem:[%s754_s9] ss:$0 sm:$0xff] }
   0xb   :  { %587 = vmatpush3.bf16.msra.mxu1 %v584_v10 }
   0xc   :  { %597 = vmatprep.subr.bf16.mxu1 %v596_v33 }
   0xd   :  { %595 = vmatpush3.bf16.msra.mxu0 %v592_v23 }
  0xdb   :  { %v539_v15 = vpop.f32.mrb[0].mxu0 }
  0xdc   :  { %v125_v16 = vadd.f32 %v539_v15, %v495_v14  ;;  %v119_v17 = vpop.f32.mrb[1].mxu0 }
  0xdd   :  { %v120_v18 = vadd.f32 %v495_v14, %v119_v17 }
  0xde   :  { %v129_v20 = vmax.f32 %v125_v16, 0.0 }
  0xdf   :  { %v128_v19 = vmax.f32 %v120_v18, 0.0 }
  0xe1   :  { %548 = vmatprep.mubr.msk.f32.mxu1 %vm141_vm1, %v128_v19 }
  0xe2   :  { %549 = vmatmul.mubr.msk.f32.vlgmr.msra.gmra.mrb[0].mxu1 %vm141_vm1, %v129_v20 }
  0xe3   :  { %599 = vmatpush3.bf16.msra.mxu1 %v596_v33 }
  0xe4   :  { %601 = vmatprep.subr.bf16.mxu1 %v600_v36 }
 0x1b5   :  { %v550_v25 = vpop.f32.mrb[0].mxu1 }
 0x1b6   :  { %v220_v26 = vadd.f32 %v550_v25, %v498_v24  ;;  %v214_v27 = vpop.f32.mrb[1].mxu1 }
 0x1b7   :  { %v215_v28 = vadd.f32 %v498_v24, %v214_v27 }
 0x1b8   :  { %v224_v30 = vmax.f32 %v220_v26, 0.0 }
 0x1b9   :  { %v223_v29 = vmax.f32 %v215_v28, 0.0 }
 0x1bb   :  { %559 = vmatprep.mubr.msk.f32.mxu0 %vm141_vm1, %v223_v29 }
 0x1bc   :  { %560 = vmatmul.mubr.msk.f32.vlgmr.msra.gmra.mrb[2].mxu0 %vm141_vm1, %v224_v30 }
 0x28f   :  { %v561_v38 = vpop.f32.mrb[2].mxu0 }
 0x290   :  { %v314_v39 = vadd.f32 %v561_v38, %v501_v37  ;;  %v308_v40 = vpop.f32.mrb[3].mxu0 }
 0x291   :  { %v309_v41 = vadd.f32 %v501_v37, %v308_v40 }
 0x292   :  { %v318_v43 = vmax.f32 %v314_v39, 0.0 }
 0x293   :  { %v317_v42 = vmax.f32 %v309_v41, 0.0 }
 0x295   :  { %566 = vmatprep.mubr.msk.f32.mxu1 %vm46_vm0, %v317_v42 }
 0x296   :  { %567 = vmatmul.mubr.msk.f32.vlgmr.msra.gmra.mrb[2].mxu1 %vm46_vm0, %v318_v43 }
 0x297   :  { %603 = vmatpush3.bf16.msra.mxu1 %v600_v36  ;;  %573 = vmatprep.mubr.msk.f32.mxu1 %vm46_vm0, %v670_v2 }
 0x29e   :  { %574 = vmatmul.mubr.msk.f32.vlgmr.msra.gmra.mrb[2].mxu1 %vm46_vm0, %v683_v7 }
 0x371   :  { %v575_v45 = vpop.f32.mrb[2].mxu1 }
 0x372   :  { %v487_v46 = vadd.f32 %v575_v45, %v508_v44  ;;  %v470_v47 = vpop.f32.mrb[3].mxu1 }
 0x373   :  { %v486_v48 = vadd.f32 %v508_v44, %v470_v47 }
 0x374   :  { %490 = vst.msk [vmem:[%s755_s10 + $0x8] sm:$0xff] %vm488_vm2, %v487_v46 }
 0x375   :  { %489 = vst.msk [vmem:[%s755_s10] sm:$0xff] %vm488_vm2, %v486_v48 }

</bundles_post_ra>
